<compile_context>
chip_gen: v7x
topology: tpu7x:2x2x1
jax: 0.10.0
libtpu: 0.0.40
codegen_flags: <defaults>
</compile_context>

<pallas_src>
import jax
import jax.numpy as jnp
from jax.experimental import pallas as pl
from jax.experimental.pallas import tpu as pltpu

HIDDEN_NEURONS = 10
IN_FEATURES = 7
OUT_FEATURES = 22

LANE = 128  # batch tiles kept a multiple of this (also satisfies the 8-sublane rule)


def _round_up(n, m):
    return ((n + m - 1) // m) * m


def mlp_softmax_kernel(x_ref, w1_ref, b1_ref, w2_ref, b2_ref, w3_ref, b3_ref, o_ref):
    """One (TB, 7) batch tile -> (TB, 22) softmax probabilities."""
    x = x_ref[...]  # (TB, 7) f32

    # Layer 1: h1 = relu(x @ W1 + b1)        -> (TB, 10)
    h1 = jnp.dot(x, w1_ref[...], preferred_element_type=jnp.float32) + b1_ref[...]
    h1 = jnp.maximum(h1, 0.0)

    # Layer 2: h2 = relu(h1 @ W2 + b2)       -> (TB, 10)
    h2 = jnp.dot(h1, w2_ref[...], preferred_element_type=jnp.float32) + b2_ref[...]
    h2 = jnp.maximum(h2, 0.0)

    # Layer 3: logits = h2 @ W3 + b3         -> (TB, 22)
    logits = jnp.dot(h2, w3_ref[...], preferred_element_type=jnp.float32) + b3_ref[...]

    # Softmax over the class axis (dim=1 of the (B, 22) output).
    m = jnp.max(logits, axis=1, keepdims=True)
    e = jnp.exp(logits - m)
    denom = jnp.sum(e, axis=1, keepdims=True)
    # EUP approximate reciprocal refined with one Newton step (~f32 accuracy).
    r = pl.reciprocal(denom, approx=True)
    r = r * (2.0 - denom * r)
    o_ref[...] = (e * r).astype(o_ref.dtype)


def detector_forward(x, params, *, batch_tile=1024):
    """x: (B, 7) float32 -> (B, 22) softmax probabilities (matches Model.forward)."""
    B = x.shape[0]
    # PyTorch stores Linear weights as (out, in); transpose once (tiny) so the kernel
    # runs plain row-major matmuls.  Biases become (1, out) rows that broadcast over
    # the sublane (batch) axis.
    w1 = params["w1"].T  # (7, 10)
    w2 = params["w2"].T  # (10, 10)
    w3 = params["w3"].T  # (10, 22)
    b1 = params["b1"].reshape(1, HIDDEN_NEURONS)
    b2 = params["b2"].reshape(1, HIDDEN_NEURONS)
    b3 = params["b3"].reshape(1, OUT_FEATURES)

    # Batch tile: multiple of the lane width, no larger than the padded batch.
    tb = min(_round_up(batch_tile, LANE), _round_up(B, LANE))
    b_pad = _round_up(B, tb)
    grid = (b_pad // tb,)

    x_in = x if b_pad == B else jnp.pad(x, ((0, b_pad - B), (0, 0)))

    x_spec = pl.BlockSpec((tb, IN_FEATURES), lambda i: (i, 0))
    out_spec = pl.BlockSpec((tb, OUT_FEATURES), lambda i: (i, 0))
    # Weights/biases: full arrays, constant index map -> fetched once, VMEM-resident.
    const = lambda arr: pl.BlockSpec(arr.shape, lambda i: (0, 0))

    out = pl.pallas_call(
        mlp_softmax_kernel,
        out_shape=jax.ShapeDtypeStruct((b_pad, OUT_FEATURES), jnp.float32),
        grid=grid,
        in_specs=[
            x_spec,
            const(w1), const(b1),
            const(w2), const(b2),
            const(w3), const(b3),
        ],
        out_specs=out_spec,
        compiler_params=pltpu.CompilerParams(
            dimension_semantics=("parallel",),   # shard batch tiles across TCs on v7x
            vmem_limit_bytes=32 * 1024 * 1024,   # tiles use well under 1 MiB
        ),
    )(x_in, w1, b1, w2, b2, w3, b3)

    return out[:B, :]


def init_params(key):
    """Synthetic init mimicking nn.Linear: uniform(-1/sqrt(fan_in), 1/sqrt(fan_in)).

    Stored in PyTorch (out, in) layout with (out,) biases, exactly like the module.
    """
    def linear(key, fan_in, fan_out):
        kw, kb = jax.random.split(key)
        bound = 1.0 / jnp.sqrt(float(fan_in))
        w = jax.random.uniform(kw, (fan_out, fan_in), jnp.float32, -bound, bound)
        b = jax.random.uniform(kb, (fan_out,), jnp.float32, -bound, bound)
        return w, b

    k1, k2, k3 = jax.random.split(key, 3)
    w1, b1 = linear(k1, IN_FEATURES, HIDDEN_NEURONS)
    w2, b2 = linear(k2, HIDDEN_NEURONS, HIDDEN_NEURONS)
    w3, b3 = linear(k3, HIDDEN_NEURONS, OUT_FEATURES)
    return {"w1": w1, "b1": b1, "w2": w2, "b2": b2, "w3": w3, "b3": b3}


def reference_forward(x, params):
    """Pure-JAX reference (PyTorch semantics: y = x @ W^T + b, softmax over dim=1)."""
    h = jnp.maximum(x @ params["w1"].T + params["b1"][None, :], 0.0)
    h = jnp.maximum(h @ params["w2"].T + params["b2"][None, :], 0.0)
    logits = h @ params["w3"].T + params["b3"][None, :]
    return jax.nn.softmax(logits, axis=1)


if __name__ == "__main__":
    key = jax.random.PRNGKey(0)
    kx, kp = jax.random.split(key)

    B = 200  # not a multiple of the 128-row tile -> exercises padding + a 2-step grid
    x = jax.random.normal(kx, (B, IN_FEATURES), dtype=jnp.float32)
    params = init_params(kp)

    out = detector_forward(x, params, batch_tile=128)
    out = jax.block_until_ready(out)

    ref = reference_forward(x, params)
    assert out.shape == (B, OUT_FEATURES)
    assert jnp.allclose(out, ref, atol=1e-5, rtol=1e-5)
    # rows of a softmax must sum to 1
    assert jnp.allclose(jnp.sum(out, axis=1), jnp.ones((B,)), atol=1e-5)

    print("KERNEL_OK")
</pallas_src>

<mosaic_0001>
module attributes {stable_mosaic.version = 11 : i64} {
  func.func @mlp_softmax_kernel(%arg0: i32, %arg1: memref<128x7xf32, #tpu.memory_space<vmem>>, %arg2: memref<7x10xf32, #tpu.memory_space<vmem>>, %arg3: memref<1x10xf32, #tpu.memory_space<vmem>>, %arg4: memref<10x10xf32, #tpu.memory_space<vmem>>, %arg5: memref<1x10xf32, #tpu.memory_space<vmem>>, %arg6: memref<10x22xf32, #tpu.memory_space<vmem>>, %arg7: memref<1x22xf32, #tpu.memory_space<vmem>>, %arg8: memref<128x22xf32, #tpu.memory_space<vmem>>) attributes {dimension_semantics = [#tpu.dimension_semantics<parallel>], iteration_bounds = array<i64: 2>, scalar_prefetch = 0 : i64, scratch_operands = 0 : i64, tpu.core_type = #tpu.core_type<tc>, window_params = [{transform_indices = @transform_0, window_bounds = array<i64: 128, 7>}, {pipeline_mode = #tpu.pipeline_mode<synchronous>, transform_indices = @transform_1, window_bounds = array<i64: 7, 10>}, {pipeline_mode = #tpu.pipeline_mode<synchronous>, transform_indices = @transform_2, window_bounds = array<i64: 1, 10>}, {pipeline_mode = #tpu.pipeline_mode<synchronous>, transform_indices = @transform_3, window_bounds = array<i64: 10, 10>}, {pipeline_mode = #tpu.pipeline_mode<synchronous>, transform_indices = @transform_4, window_bounds = array<i64: 1, 10>}, {pipeline_mode = #tpu.pipeline_mode<synchronous>, transform_indices = @transform_5, window_bounds = array<i64: 10, 22>}, {pipeline_mode = #tpu.pipeline_mode<synchronous>, transform_indices = @transform_6, window_bounds = array<i64: 1, 22>}, {transform_indices = @transform_7, window_bounds = array<i64: 128, 22>}]} {
    %c0 = arith.constant 0 : index
    %c0_0 = arith.constant 0 : index
    %0 = vector.load %arg1[%c0, %c0_0] : memref<128x7xf32, #tpu.memory_space<vmem>>, vector<128x7xf32>
    %c0_1 = arith.constant 0 : index
    %c0_2 = arith.constant 0 : index
    %1 = vector.load %arg2[%c0_1, %c0_2] : memref<7x10xf32, #tpu.memory_space<vmem>>, vector<7x10xf32>
    %cst = arith.constant dense<0.000000e+00> : vector<128x10xf32>
    %2 = tpu.matmul %0, %1, %cst {dimension_numbers = #tpu.dot_dimension_numbers<[1], [0], [0], [1], [0, 0, 1, 1], [], []>} : vector<128x7xf32>, vector<7x10xf32>, vector<128x10xf32> -> vector<128x10xf32>
    %c0_3 = arith.constant 0 : index
    %c0_4 = arith.constant 0 : index
    %3 = vector.load %arg3[%c0_3, %c0_4] : memref<1x10xf32, #tpu.memory_space<vmem>>, vector<1x10xf32>
    %4 = vector.broadcast %3 : vector<1x10xf32> to vector<128x10xf32>
    %5 = arith.addf %2, %4 : vector<128x10xf32>
    %cst_5 = arith.constant 0.000000e+00 : f32
    %6 = vector.broadcast %cst_5 : f32 to vector<128x10xf32>
    %7 = arith.maximumf %5, %6 : vector<128x10xf32>
    %c0_6 = arith.constant 0 : index
    %c0_7 = arith.constant 0 : index
    %8 = vector.load %arg4[%c0_6, %c0_7] : memref<10x10xf32, #tpu.memory_space<vmem>>, vector<10x10xf32>
    %cst_8 = arith.constant dense<0.000000e+00> : vector<128x10xf32>
    %9 = tpu.matmul %7, %8, %cst_8 {dimension_numbers = #tpu.dot_dimension_numbers<[1], [0], [0], [1], [0, 0, 1, 1], [], []>} : vector<128x10xf32>, vector<10x10xf32>, vector<128x10xf32> -> vector<128x10xf32>
    %c0_9 = arith.constant 0 : index
    %c0_10 = arith.constant 0 : index
    %10 = vector.load %arg5[%c0_9, %c0_10] : memref<1x10xf32, #tpu.memory_space<vmem>>, vector<1x10xf32>
    %11 = vector.broadcast %10 : vector<1x10xf32> to vector<128x10xf32>
    %12 = arith.addf %9, %11 : vector<128x10xf32>
    %cst_11 = arith.constant 0.000000e+00 : f32
    %13 = vector.broadcast %cst_11 : f32 to vector<128x10xf32>
    %14 = arith.maximumf %12, %13 : vector<128x10xf32>
    %c0_12 = arith.constant 0 : index
    %c0_13 = arith.constant 0 : index
    %15 = vector.load %arg6[%c0_12, %c0_13] : memref<10x22xf32, #tpu.memory_space<vmem>>, vector<10x22xf32>
    %cst_14 = arith.constant dense<0.000000e+00> : vector<128x22xf32>
    %16 = tpu.matmul %14, %15, %cst_14 {dimension_numbers = #tpu.dot_dimension_numbers<[1], [0], [0], [1], [0, 0, 1, 1], [], []>} : vector<128x10xf32>, vector<10x22xf32>, vector<128x22xf32> -> vector<128x22xf32>
    %c0_15 = arith.constant 0 : index
    %c0_16 = arith.constant 0 : index
    %17 = vector.load %arg7[%c0_15, %c0_16] : memref<1x22xf32, #tpu.memory_space<vmem>>, vector<1x22xf32>
    %18 = vector.broadcast %17 : vector<1x22xf32> to vector<128x22xf32>
    %19 = arith.addf %16, %18 : vector<128x22xf32>
    %cst_17 = arith.constant dense<0xFF800000> : vector<128xf32>
    %20 = vector.multi_reduction <maximumf>, %19, %cst_17 [1] : vector<128x22xf32> to vector<128xf32>
    %21 = vector.shape_cast %20 : vector<128xf32> to vector<128x1xf32>
    %22 = vector.broadcast %21 : vector<128x1xf32> to vector<128x22xf32>
    %23 = arith.subf %19, %22 : vector<128x22xf32>
    %24 = math.exp %23 : vector<128x22xf32>
    %cst_18 = arith.constant dense<0.000000e+00> : vector<128xf32>
    %25 = vector.multi_reduction <add>, %24, %cst_18 [1] : vector<128x22xf32> to vector<128xf32>
    %26 = vector.shape_cast %25 : vector<128xf32> to vector<128x1xf32>
    %27 = tpu.reciprocal %26 {approx = true} : vector<128x1xf32> -> vector<128x1xf32>
    %28 = arith.mulf %26, %27 : vector<128x1xf32>
    %cst_19 = arith.constant 2.000000e+00 : f32
    %29 = vector.broadcast %cst_19 : f32 to vector<128x1xf32>
    %30 = arith.subf %29, %28 : vector<128x1xf32>
    %31 = arith.mulf %27, %30 : vector<128x1xf32>
    %32 = vector.broadcast %31 : vector<128x1xf32> to vector<128x22xf32>
    %33 = arith.mulf %24, %32 : vector<128x22xf32>
    %c0_20 = arith.constant 0 : index
    %c0_21 = arith.constant 0 : index
    %34 = vector.load %arg8[%c0_20, %c0_21] : memref<128x22xf32, #tpu.memory_space<vmem>>, vector<128x22xf32>
    tpu.vector_store %arg8[%c0_20, %c0_21], %33 {strides = array<i32>} : memref<128x22xf32, #tpu.memory_space<vmem>>, vector<128x22xf32>,
    return
  }
  func.func @transform_0(%arg0: i32) -> (i32, i32) {
    %c0_i32 = arith.constant 0 : i32
    %c0_i32_0 = arith.constant 0 : i32
    return %arg0, %c0_i32 : i32, i32
  }
  func.func @transform_1(%arg0: i32) -> (i32, i32) {
    %c0_i32 = arith.constant 0 : i32
    %c0_i32_0 = arith.constant 0 : i32
    %c0_i32_1 = arith.constant 0 : i32
    return %c0_i32, %c0_i32_0 : i32, i32
  }
  func.func @transform_2(%arg0: i32) -> (i32, i32) {
    %c0_i32 = arith.constant 0 : i32
    %c0_i32_0 = arith.constant 0 : i32
    %c0_i32_1 = arith.constant 0 : i32
    return %c0_i32, %c0_i32_0 : i32, i32
  }
  func.func @transform_3(%arg0: i32) -> (i32, i32) {
    %c0_i32 = arith.constant 0 : i32
    %c0_i32_0 = arith.constant 0 : i32
    %c0_i32_1 = arith.constant 0 : i32
    return %c0_i32, %c0_i32_0 : i32, i32
  }
  func.func @transform_4(%arg0: i32) -> (i32, i32) {
    %c0_i32 = arith.constant 0 : i32
    %c0_i32_0 = arith.constant 0 : i32
    %c0_i32_1 = arith.constant 0 : i32
    return %c0_i32, %c0_i32_0 : i32, i32
  }
  func.func @transform_5(%arg0: i32) -> (i32, i32) {
    %c0_i32 = arith.constant 0 : i32
    %c0_i32_0 = arith.constant 0 : i32
    %c0_i32_1 = arith.constant 0 : i32
    return %c0_i32, %c0_i32_0 : i32, i32
  }
  func.func @transform_6(%arg0: i32) -> (i32, i32) {
    %c0_i32 = arith.constant 0 : i32
    %c0_i32_0 = arith.constant 0 : i32
    %c0_i32_1 = arith.constant 0 : i32
    return %c0_i32, %c0_i32_0 : i32, i32
  }
  func.func @transform_7(%arg0: i32) -> (i32, i32) {
    %c0_i32 = arith.constant 0 : i32
    %c0_i32_0 = arith.constant 0 : i32
    return %arg0, %c0_i32 : i32, i32
  }
}

</mosaic_0001>

<bundles_post_ra>
// kernel: tpu_custom_call.1
= control target key start
LH: loop header
LB: loop body
LE: loop exit
PB: predicated region body
PF: predicated region fallthrough
CT: control target
= control target key end

     0   :  { %s1581_s24 = smov 0   ;;  %s1901_s0 = inlined_call_operand.vmem [shape: f32[256,7], index: 0, kind: input, shape index: {}]   ;;  %s1902_s1 = inlined_call_operand.vmem [shape: f32[7,10], index: 1, kind: input, shape index: {}]   ;;  %s1903_s2 = inlined_call_operand.vmem [shape: f32[1,10], index: 2, kind: input, shape index: {}]   ;;  %s1904_s3 = inlined_call_operand.vmem [shape: f32[10,10], index: 3, kind: input, shape index: {}]   ;;  %s1905_s4 = inlined_call_operand.vmem [shape: f32[1,10], index: 4, kind: input, shape index: {}]   ;;  %s1906_s5 = inlined_call_operand.vmem [shape: f32[10,22], index: 5, kind: input, shape index: {}]   ;;  %s1907_s6 = inlined_call_operand.vmem [shape: f32[1,22], index: 6, kind: input, shape index: {}]   ;;  %s1908_s7 = inlined_call_operand.vmem [shape: f32[256,22], index: 7, kind: output, shape index: {}]  }
   0x1 LB: > { %s1245_s25 = sadd.s32 4294967295, %s1538_s24   ;;  %p1249_p0 = scmp.ge.s32.totalorder %s1538_s24, 1  ;;  %s1538_s24 = sphi %s1581_s24, %s17_s24  }
   0x2   : > { %p238_p1 = scmp.lt.s32.totalorder %s1538_s24, 3 }
   0x4   : > { %p239_p2 = pnand %p1249_p0, %p238_p1 }
   0x5   : > { %v298_v0 = vld [vmem:[%s1902_s1] sm:$0x7f] (!%p239_p2)  ;;  %vm355_vm0 = vcmask (!%p239_p2), 1046528   ;;  %s1250_s28 = sshll.u32 (!%p239_p2), %s1245_s25, 4  ;;  %v521_v2 = vld [vmem:[%s1904_s3 + $0x8] sm:$0x3] (!%p239_p2) }
   0x6   : > { %242 = sbr.rel (%p239_p2) target bundleno = 1022 (0x3fe), region = 48  ;;  %v520_v1 = vld [vmem:[%s1904_s3] sm:$0xff] (!%p239_p2)  ;;  %1363 = vmatprep.subr.msk.mxu0 (!%p239_p2), %vm355_vm0, %v298_v0  ;;  %p271_p3 = scmp.lt.s32.totalorder (!%p239_p2), %s1250_s28, 31  ;;  %1457 = vmatprep.subr.msk.mxu1 (!%p239_p2), %vm355_vm0, %v298_v0  ;;  %vm578_vm1 = vcmask (!%p239_p2), 1041408   ;;  %vm1540_vm2 = vmmov (!%p239_p2), 1   ;;  %vm306_vm4 = vcmask (!%p239_p2), 56320  }
   0x7   : > { %1364 = vmatpush3.msk.msra.mxu0 (!%p239_p2), %vm355_vm0, %v298_v0  ;;  %1458 = vmatpush3.msk.msra.mxu1 (!%p239_p2), %vm355_vm0, %v298_v0  ;;  %v1445_v3 = vpack.c.bf16 (!%p239_p2), %v521_v2, %v520_v1  ;;  %vm1598_vm3 = vmpackc.low (!%p239_p2), %vm578_vm1, %vm1540_vm2  ;;  %v743_v21 = vld [vmem:[%s1906_s5] sm:$0xff] (!%p239_p2)  ;;  %v744_v22 = vld [vmem:[%s1906_s5 + $0x8] sm:$0x3] (!%p239_p2)  ;;  %vm529_vm5 = vcmask (!%p239_p2), 80896   ;;  %vm948_vm6 = vcmask (!%p239_p2), 179200  }
   0x8   : > { %v1451_v23 = vpack.c.bf16 (!%p239_p2), %v744_v22, %v743_v21  ;;  %v1254_v24 = vld [vmem:[%s1903_s2] ss:$0 sm:$0xff] (!%p239_p2) }
   0x9   : > { %1447 = vmatprep.subr.msk.bf16.mxu1 (!%p239_p2), %vm1598_vm3, %v1445_v3 }
   0xa   : > { %1453 = vmatprep.subr.msk.bf16.mxu0 (!%p239_p2), %vm1598_vm3, %v1451_v23 }
   0xd   : > { %s1912_s28 = smov (!%p271_p3, %s1250_s28), 31 }
   0xe   : > { %s1251_s10 = sshll.u32 %s1912_s28, 3 }
   0xf   : > { %s1612_s13 = scalar_lea.vmem %s1901_s0, %s1251_s10  ;;  %s1848_s27 = scalar_lea.vmem %s1908_s7, %s1251_s10 }
  0x10   : > { %v282_v5 = vld [vmem:[%s1612_s13] sm:$0xff]  ;;  %v283_v6 = vld [vmem:[%s1612_s13 + $0x8] sm:$0xff]  ;;  %v284_v7 = vld [vmem:[%s1612_s13 + $0x10] sm:$0xff] }
  0x11   : > { %1365 = vmatprep.mubr.msk.f32.mxu0 %vm306_vm4, %v282_v5  ;;  %v290_v8 = vld [vmem:[%s1612_s13 + $0x40] sm:$0xff]  ;;  %v285_v9 = vld [vmem:[%s1612_s13 + $0x18] sm:$0xff]  ;;  %v291_v10 = vld [vmem:[%s1612_s13 + $0x48] sm:$0xff] }
  0x12   : > { %1366 = vmatmul.mubr.msk.f32.vlgmr.msra.gmra.mrb[0].mxu0 %vm306_vm4, %v283_v6  ;;  %1377 = vmatprep.mubr.msk.f32.mxu1 %vm306_vm4, %v290_v8  ;;  %v292_v11 = vld [vmem:[%s1612_s13 + $0x50] sm:$0xff]  ;;  %v286_v12 = vld [vmem:[%s1612_s13 + $0x20] sm:$0xff]  ;;  %v293_v13 = vld [vmem:[%s1612_s13 + $0x58] sm:$0xff] }
  0x13   : > { %1368 = vmatprep.mubr.msk.f32.mxu0 %vm306_vm4, %v284_v7  ;;  %1378 = vmatmul.mubr.msk.f32.vlgmr.msra.gmra.mrb[0].mxu1 %vm306_vm4, %v291_v10  ;;  %v294_v14 = vld [vmem:[%s1612_s13 + $0x60] sm:$0xff]  ;;  %v287_v15 = vld [vmem:[%s1612_s13 + $0x28] sm:$0xff]  ;;  %v288_v16 = vld [vmem:[%s1612_s13 + $0x30] sm:$0xff] }
  0x14   : > { %1380 = vmatprep.mubr.msk.f32.mxu1 %vm306_vm4, %v292_v11  ;;  %1450 = vmatpush3.bf16.msk.msra.mxu1 %vm1598_vm3, %v1445_v3  ;;  %v295_v17 = vld [vmem:[%s1612_s13 + $0x68] sm:$0xff]  ;;  %v296_v18 = vld [vmem:[%s1612_s13 + $0x70] sm:$0xff]  ;;  %v289_v19 = vld [vmem:[%s1612_s13 + $0x38] sm:$0xff] }
  0x15   : > { %v297_v20 = vld [vmem:[%s1612_s13 + $0x78] sm:$0xff]  ;;  %1456 = vmatpush3.bf16.msk.msra.mxu0 %vm1598_vm3, %v1451_v23 }
  0x16   : > { %1369 = vmatmul.mubr.msk.f32.gmra.mrb[2].mxu0 %vm306_vm4, %v285_v9  ;;  %v1272_v9 = vld [vmem:[%s1905_s4] ss:$0 sm:$0xff] }
  0x17   : > { %1371 = vmatprep.mubr.msk.f32.mxu0 %vm306_vm4, %v286_v12  ;;  %1381 = vmatmul.mubr.msk.f32.gmra.mrb[2].mxu1 %vm306_vm4, %v293_v13 }
  0x18   : > { %1383 = vmatprep.mubr.msk.f32.mxu1 %vm306_vm4, %v294_v14 }
  0x1a   : > { %1372 = vmatmul.mubr.msk.f32.gmra.mrb[4].mxu0 %vm306_vm4, %v287_v15 }
  0x1b   : > { %1374 = vmatprep.mubr.msk.f32.mxu0 %vm306_vm4, %v288_v16  ;;  %1384 = vmatmul.mubr.msk.f32.gmra.mrb[4].mxu1 %vm306_vm4, %v295_v17 }
  0x1c   : > { %1386 = vmatprep.mubr.msk.f32.mxu1 %vm306_vm4, %v296_v18 }
  0x1e   : > { %1375 = vmatmul.mubr.msk.f32.gmra.mrb[6].mxu0 %vm306_vm4, %v289_v19 }
  0x1f   : > { %1387 = vmatmul.mubr.msk.f32.gmra.mrb[6].mxu1 %vm306_vm4, %v297_v20 }
  0xe5   : > { %v1367_v25 = vpop.f32.mrb[0].mxu0 }
  0xe6   : > { %v431_v26 = vadd.f32 %v1367_v25, %v1254_v24  ;;  %v425_v27 = vpop.f32.mrb[1].mxu0  ;;  %v1379_v29 = vpop.f32.mrb[0].mxu1 }
  0xe7   : > { %v426_v28 = vadd.f32 %v1254_v24, %v425_v27  ;;  %v465_v30 = vpop.f32.mrb[1].mxu1  ;;  %v471_v56 = vadd.f32 %v1379_v29, %v1254_v24 }
  0xe8   : > { %v505_v33 = vmax.f32 %v431_v26, 0.0  ;;  %v466_v50 = vadd.f32 %v1254_v24, %v465_v30 }
  0xe9   : > { %v504_v31 = vmax.f32 %v426_v28, 0.0  ;;  %v1370_v32 = vpop.f32.mrb[2].mxu0  ;;  %v513_v61 = vmax.f32 %v471_v56, 0.0 }
  0xea   : > { %v441_v34 = vadd.f32 %v1370_v32, %v1254_v24  ;;  %v435_v35 = vpop.f32.mrb[3].mxu0  ;;  %v1382_v37 = vpop.f32.mrb[2].mxu1  ;;  %v512_v59 = vmax.f32 %v466_v50, 0.0 }
  0xeb   : > { %v436_v36 = vadd.f32 %v1254_v24, %v435_v35  ;;  %1393 = vmatprep.mubr.msk.f32.mxu1 %vm529_vm5, %v504_v31  ;;  %v475_v38 = vpop.f32.mrb[3].mxu1  ;;  %v481_v62 = vadd.f32 %v1382_v37, %v1254_v24 }
  0xec   : > { %1394 = vmatmul.mubr.msk.f32.vlgmr.msra.gmra.mrb[8].mxu1 %vm529_vm5, %v505_v33  ;;  %v507_v41 = vmax.f32 %v441_v34, 0.0  ;;  %v476_v60 = vadd.f32 %v1254_v24, %v475_v38 }
  0xed   : > { %v506_v39 = vmax.f32 %v436_v36, 0.0  ;;  %v1373_v40 = vpop.f32.mrb[4].mxu0  ;;  %v515_v1 = vmax.f32 %v481_v62, 0.0 }
  0xee   : > { %v451_v42 = vadd.f32 %v1373_v40, %v1254_v24  ;;  %v445_v43 = vpop.f32.mrb[5].mxu0  ;;  %v1385_v45 = vpop.f32.mrb[4].mxu1  ;;  %v514_v63 = vmax.f32 %v476_v60, 0.0 }
  0xef   : > { %v446_v44 = vadd.f32 %v1254_v24, %v445_v43  ;;  %1396 = vmatprep.mubr.msk.f32.mxu1 %vm529_vm5, %v506_v39  ;;  %v485_v47 = vpop.f32.mrb[5].mxu1  ;;  %v491_v2 = vadd.f32 %v1385_v45, %v1254_v24 }
  0xf0   : > { %v509_v46 = vmax.f32 %v451_v42, 0.0  ;;  %1397 = vmatmul.mubr.msk.f32.gmra.mrb[10].mxu1 %vm529_vm5, %v507_v41  ;;  %v486_v0 = vadd.f32 %v1254_v24, %v485_v47 }
  0xf1   : > { %v508_v48 = vmax.f32 %v446_v44, 0.0  ;;  %v1376_v49 = vpop.f32.mrb[6].mxu0  ;;  %v517_v5 = vmax.f32 %v491_v2, 0.0 }
  0xf2   : > { %v461_v51 = vadd.f32 %v1376_v49, %v1254_v24  ;;  %v455_v52 = vpop.f32.mrb[7].mxu0  ;;  %v1388_v54 = vpop.f32.mrb[6].mxu1  ;;  %v516_v3 = vmax.f32 %v486_v0, 0.0 }
  0xf3   : > { %v456_v53 = vadd.f32 %v1254_v24, %v455_v52  ;;  %1399 = vmatprep.mubr.msk.f32.mxu1 %vm529_vm5, %v508_v48  ;;  %v495_v57 = vpop.f32.mrb[7].mxu1  ;;  %v501_v6 = vadd.f32 %v1388_v54, %v1254_v24 }
  0xf4   : > { %v511_v55 = vmax.f32 %v461_v51, 0.0  ;;  %1400 = vmatmul.mubr.msk.f32.gmra.mrb[12].mxu1 %vm529_vm5, %v509_v46  ;;  %v496_v4 = vadd.f32 %v1254_v24, %v495_v57 }
  0xf5   : > { %v510_v58 = vmax.f32 %v456_v53, 0.0  ;;  %v519_v8 = vmax.f32 %v501_v6, 0.0 }
  0xf6   : > { %v518_v7 = vmax.f32 %v496_v4, 0.0 }
  0xf7   : > { %1402 = vmatprep.mubr.msk.f32.mxu1 %vm529_vm5, %v510_v58  ;;  %v1290_v58 = vld [vmem:[%s1907_s6] ss:$0 sm:$0xff] }
  0xf8   : > { %1403 = vmatmul.mubr.msk.f32.gmra.mrb[14].mxu1 %vm529_vm5, %v511_v55 }
  0xf9   : > { %1405 = vmatprep.mubr.msk.f32.mxu1 %vm529_vm5, %v512_v59 }
  0xfc   : > { %1406 = vmatmul.mubr.msk.f32.gmra.mrb[16].mxu1 %vm529_vm5, %v513_v61 }
  0xfd   : > { %1408 = vmatprep.mubr.msk.f32.mxu1 %vm529_vm5, %v514_v63 }
 0x100   : > { %1409 = vmatmul.mubr.msk.f32.gmra.mrb[18].mxu1 %vm529_vm5, %v515_v1 }
 0x101   : > { %1411 = vmatprep.mubr.msk.f32.mxu1 %vm529_vm5, %v516_v3 }
 0x104   : > { %1412 = vmatmul.mubr.msk.f32.gmra.mrb[20].mxu1 %vm529_vm5, %v517_v5 }
 0x105   : > { %1414 = vmatprep.mubr.msk.f32.mxu1 %vm529_vm5, %v518_v7 }
 0x108   : > { %1415 = vmatmul.mubr.msk.f32.gmra.mrb[22].mxu1 %vm529_vm5, %v519_v8 }
 0x1bf   : > { %v1395_v10 = vpop.f32.mrb[8].mxu1 }
 0x1c0   : > { %v654_v11 = vadd.f32 %v1395_v10, %v1272_v9  ;;  %v648_v12 = vpop.f32.mrb[9].mxu1 }
 0x1c1   : > { %v649_v13 = vadd.f32 %v1272_v9, %v648_v12 }
 0x1c2   : > { %v728_v16 = vmax.f32 %v654_v11, 0.0 }
 0x1c3   : > { %v727_v14 = vmax.f32 %v649_v13, 0.0  ;;  %v1398_v15 = vpop.f32.mrb[10].mxu1 }
 0x1c4   : > { %v664_v17 = vadd.f32 %v1398_v15, %v1272_v9  ;;  %v658_v18 = vpop.f32.mrb[11].mxu1 }
 0x1c5   : > { %v659_v19 = vadd.f32 %v1272_v9, %v658_v18  ;;  %1421 = vmatprep.mubr.msk.f32.mxu0 %vm529_vm5, %v727_v14 }
 0x1c6   : > { %1422 = vmatmul.mubr.msk.f32.vlgmr.msra.gmra.mrb[8].mxu0 %vm529_vm5, %v728_v16  ;;  %v730_v22 = vmax.f32 %v664_v17, 0.0 }
 0x1c7   : > { %v729_v20 = vmax.f32 %v659_v19, 0.0  ;;  %v1401_v21 = vpop.f32.mrb[12].mxu1 }
 0x1c8   : > { %v674_v23 = vadd.f32 %v1401_v21, %v1272_v9  ;;  %v668_v24 = vpop.f32.mrb[13].mxu1 }
 0x1c9   : > { %v669_v25 = vadd.f32 %v1272_v9, %v668_v24  ;;  %1424 = vmatprep.mubr.msk.f32.mxu0 %vm529_vm5, %v729_v20 }
 0x1ca   : > { %v732_v26 = vmax.f32 %v674_v23, 0.0  ;;  %1425 = vmatmul.mubr.msk.f32.gmra.mrb[10].mxu0 %vm529_vm5, %v730_v22 }
 0x1cb   : > { %v731_v27 = vmax.f32 %v669_v25, 0.0  ;;  %v1404_v28 = vpop.f32.mrb[14].mxu1 }
 0x1cc   : > { %v684_v29 = vadd.f32 %v1404_v28, %v1272_v9  ;;  %v678_v30 = vpop.f32.mrb[15].mxu1 }
 0x1cd   : > { %v679_v31 = vadd.f32 %v1272_v9, %v678_v30  ;;  %1427 = vmatprep.mubr.msk.f32.mxu0 %vm529_vm5, %v731_v27 }
 0x1ce   : > { %v734_v32 = vmax.f32 %v684_v29, 0.0  ;;  %1428 = vmatmul.mubr.msk.f32.gmra.mrb[12].mxu0 %vm529_vm5, %v732_v26 }
 0x1cf   : > { %v733_v33 = vmax.f32 %v679_v31, 0.0  ;;  %v1407_v34 = vpop.f32.mrb[16].mxu1 }
 0x1d0   : > { %v694_v35 = vadd.f32 %v1407_v34, %v1272_v9  ;;  %v688_v36 = vpop.f32.mrb[17].mxu1 }
 0x1d1   : > { %v689_v37 = vadd.f32 %v1272_v9, %v688_v36  ;;  %1430 = vmatprep.mubr.msk.f32.mxu0 %vm529_vm5, %v733_v33 }
 0x1d2   : > { %v736_v38 = vmax.f32 %v694_v35, 0.0  ;;  %1431 = vmatmul.mubr.msk.f32.gmra.mrb[14].mxu0 %vm529_vm5, %v734_v32 }
 0x1d3   : > { %v735_v39 = vmax.f32 %v689_v37, 0.0  ;;  %v1410_v40 = vpop.f32.mrb[18].mxu1 }
 0x1d4   : > { %v704_v41 = vadd.f32 %v1410_v40, %v1272_v9  ;;  %v698_v42 = vpop.f32.mrb[19].mxu1 }
 0x1d5   : > { %v699_v43 = vadd.f32 %v1272_v9, %v698_v42  ;;  %1433 = vmatprep.mubr.msk.f32.mxu0 %vm529_vm5, %v735_v39 }
 0x1d6   : > { %v738_v44 = vmax.f32 %v704_v41, 0.0  ;;  %1434 = vmatmul.mubr.msk.f32.gmra.mrb[16].mxu0 %vm529_vm5, %v736_v38 }
 0x1d7   : > { %v737_v45 = vmax.f32 %v699_v43, 0.0  ;;  %v1413_v46 = vpop.f32.mrb[20].mxu1 }
 0x1d8   : > { %v714_v47 = vadd.f32 %v1413_v46, %v1272_v9  ;;  %v708_v48 = vpop.f32.mrb[21].mxu1 }
 0x1d9   : > { %v709_v49 = vadd.f32 %v1272_v9, %v708_v48  ;;  %1436 = vmatprep.mubr.msk.f32.mxu0 %vm529_vm5, %v737_v45 }
 0x1da   : > { %v740_v50 = vmax.f32 %v714_v47, 0.0  ;;  %1437 = vmatmul.mubr.msk.f32.gmra.mrb[18].mxu0 %vm529_vm5, %v738_v44 }
 0x1db   : > { %v739_v51 = vmax.f32 %v709_v49, 0.0  ;;  %v1416_v52 = vpop.f32.mrb[22].mxu1 }
 0x1dc   : > { %v724_v53 = vadd.f32 %v1416_v52, %v1272_v9  ;;  %v718_v54 = vpop.f32.mrb[23].mxu1 }
 0x1dd   : > { %v719_v55 = vadd.f32 %v1272_v9, %v718_v54  ;;  %1439 = vmatprep.mubr.msk.f32.mxu0 %vm529_vm5, %v739_v51 }
 0x1de   : > { %v742_v56 = vmax.f32 %v724_v53, 0.0  ;;  %1440 = vmatmul.mubr.msk.f32.gmra.mrb[20].mxu0 %vm529_vm5, %v740_v50 }
 0x1df   : > { %v741_v57 = vmax.f32 %v719_v55, 0.0 }
 0x1e1   : > { %1442 = vmatprep.mubr.msk.f32.mxu0 %vm529_vm5, %v741_v57 }
 0x1e2   : > { %1443 = vmatmul.mubr.msk.f32.gmra.mrb[22].mxu0 %vm529_vm5, %v742_v56 }
 0x299   : > { %v1423_v59 = vpop.f32.mrb[8].mxu0 }
 0x29a   : > { %v1699_v60 = vadd.f32 %v1423_v59, %v1290_v58  ;;  %v869_v61 = vpop.f32.mrb[9].mxu0 }
 0x29b   : > { %v1701_v62 = vadd.f32 %v1290_v58, %v869_v61 }
 0x29c   : > { %v952_v63 = vsel %vm948_vm6, %v1699_v60, -inf }
 0x29d   : > { %953 = vmax.xlane.f32.xlu0 %v952_v63  ;;  %v1426_v0 = vpop.f32.mrb[10].mxu0  ;;  %v949_v5 = vsel %vm948_vm6, %v1701_v62, -inf }
 0x29e   : > { %v1705_v1 = vadd.f32 %v1426_v0, %v1290_v58  ;;  %v879_v2 = vpop.f32.mrb[11].mxu0 }
 0x29f   : > { %v1707_v3 = vadd.f32 %v1290_v58, %v879_v2 }
 0x2a0   : > { %v958_v4 = vsel %vm948_vm6, %v1705_v1, -inf }
 0x2a1   : > { %959 = vmax.xlane.f32.xlu1 %v958_v4  ;;  %v1429_v6 = vpop.f32.mrb[12].mxu0  ;;  %950 = vmax.xlane.f32.xlu0 %v949_v5  ;;  %v955_v10 = vsel %vm948_vm6, %v1707_v3, -inf }
 0x2a2   : > { %v889_v7 = vpop.f32.mrb[13].mxu0  ;;  %v1715_v9 = vadd.f32 %v1429_v6, %v1290_v58 }
 0x2a3   : > { %v1713_v8 = vadd.f32 %v1290_v58, %v889_v7 }
 0x2a4   : > { %v964_v16 = vsel %vm948_vm6, %v1715_v9, -inf }
 0x2a5   : > { %v1432_v11 = vpop.f32.mrb[14].mxu0  ;;  %956 = vmax.xlane.f32.xlu1 %v955_v10  ;;  %v961_v12 = vsel %vm948_vm6, %v1713_v8, -inf }
 0x2a6   : > { %v899_v13 = vpop.f32.mrb[15].mxu0  ;;  %962 = vmax.xlane.f32.xlu0 %v961_v12  ;;  %v1723_v15 = vadd.f32 %v1432_v11, %v1290_v58 }
 0x2a7   : > { %v1721_v14 = vadd.f32 %v1290_v58, %v899_v13 }
 0x2a8   : > { %v970_v22 = vsel %vm948_vm6, %v1723_v15, -inf }
 0x2a9   : > { %v1435_v17 = vpop.f32.mrb[16].mxu0  ;;  %965 = vmax.xlane.f32.xlu1 %v964_v16  ;;  %v967_v18 = vsel %vm948_vm6, %v1721_v14, -inf }
 0x2aa   : > { %v909_v19 = vpop.f32.mrb[17].mxu0  ;;  %968 = vmax.xlane.f32.xlu0 %v967_v18  ;;  %v1731_v21 = vadd.f32 %v1435_v17, %v1290_v58 }
 0x2ab   : > { %v1729_v20 = vadd.f32 %v1290_v58, %v909_v19 }
 0x2ac   : > { %v976_v28 = vsel %vm948_vm6, %v1731_v21, -inf }
 0x2ad   : > { %v1438_v23 = vpop.f32.mrb[18].mxu0  ;;  %971 = vmax.xlane.f32.xlu1 %v970_v22  ;;  %v973_v24 = vsel %vm948_vm6, %v1729_v20, -inf }
 0x2ae   : > { %v919_v25 = vpop.f32.mrb[19].mxu0  ;;  %974 = vmax.xlane.f32.xlu0 %v973_v24  ;;  %v1739_v27 = vadd.f32 %v1438_v23, %v1290_v58 }
 0x2af   : > { %v1737_v26 = vadd.f32 %v1290_v58, %v919_v25 }
 0x2b0   : > { %v982_v34 = vsel %vm948_vm6, %v1739_v27, -inf }
 0x2b1   : > { %v1441_v29 = vpop.f32.mrb[20].mxu0  ;;  %977 = vmax.xlane.f32.xlu1 %v976_v28  ;;  %v979_v30 = vsel %vm948_vm6, %v1737_v26, -inf }
 0x2b2   : > { %v929_v31 = vpop.f32.mrb[21].mxu0  ;;  %980 = vmax.xlane.f32.xlu0 %v979_v30  ;;  %v1747_v33 = vadd.f32 %v1441_v29, %v1290_v58 }
 0x2b3   : > { %v1745_v32 = vadd.f32 %v1290_v58, %v929_v31 }
 0x2b4   : > { %v988_v40 = vsel %vm948_vm6, %v1747_v33, -inf }
 0x2b5   : > { %v1444_v35 = vpop.f32.mrb[22].mxu0  ;;  %983 = vmax.xlane.f32.xlu1 %v982_v34  ;;  %v985_v36 = vsel %vm948_vm6, %v1745_v32, -inf }
 0x2b6   : > { %v939_v37 = vpop.f32.mrb[23].mxu0  ;;  %986 = vmax.xlane.f32.xlu0 %v985_v36  ;;  %v1755_v39 = vadd.f32 %v1444_v35, %v1290_v58 }
 0x2b7   : > { %v1753_v38 = vadd.f32 %v1290_v58, %v939_v37 }
 0x2b8   : > { %v994_v42 = vsel %vm948_vm6, %v1755_v39, -inf }
 0x2b9   : > { %989 = vmax.xlane.f32.xlu1 %v988_v40  ;;  %v991_v41 = vsel %vm948_vm6, %v1753_v38, -inf }
 0x2ba   : > { %992 = vmax.xlane.f32.xlu0 %v991_v41 }
 0x2bd   : > { %995 = vmax.xlane.f32.xlu1 %v994_v42 }
 0x32a   : > { %v954_v43 = vpop.xlane.xlu0 %953 }
 0x32b   : > { %v998_v44 = vsub.f32 %v1699_v60, %v954_v43 }
 0x32d   : > { %v1015_v45 = vmul.f32 1.442695, %v998_v44 }
 0x32e   : > { %v960_v46 = vpop.xlane.xlu1 %959  ;;  %v951_v47 = vpop.xlane.xlu0 %950 }
 0x32f   : > { %1468 = vpow2.f32 %v1015_v45  ;;  %v1000_v48 = vsub.f32 %v1705_v1, %v960_v46  ;;  %v997_v49 = vsub.f32 %v1701_v62, %v951_v47 }
 0x331   : > { %v1019_v50 = vmul.f32 1.442695, %v1000_v48  ;;  %v1013_v51 = vmul.f32 1.442695, %v997_v49 }
 0x332   : > { %v957_v52 = vpop.xlane.xlu1 %956 }
 0x333   : > { %1470 = vpow2.f32 %v1019_v50  ;;  %v999_v53 = vsub.f32 %v1707_v3, %v957_v52  ;;  %v963_v54 = vpop.xlane.xlu0 %962 }
 0x334   : > { %1472 = vpow2.f32 %v1013_v51  ;;  %v1001_v55 = vsub.f32 %v1713_v8, %v963_v54 }
 0x335   : > { %v1017_v56 = vmul.f32 1.442695, %v999_v53 }
 0x336   : > { %v1021_v57 = vmul.f32 1.442695, %v1001_v55  ;;  %v966_v58 = vpop.xlane.xlu1 %965 }
 0x337   : > { %1474 = vpow2.f32 %v1017_v56  ;;  %v1002_v59 = vsub.f32 %v1715_v9, %v966_v58  ;;  %v969_v60 = vpop.xlane.xlu0 %968 }
 0x338   : > { %v1003_v61 = vsub.f32 %v1721_v14, %v969_v60  ;;  %1476 = vpow2.f32 %v1021_v57 }
 0x339   : > { %v1770_v62 = vpop.eup %1468  ;;  %v1023_v63 = vmul.f32 1.442695, %v1002_v59 }
 0x33a   : > { %v1025_v0 = vmul.f32 1.442695, %v1003_v61  ;;  %v972_v1 = vpop.xlane.xlu1 %971  ;;  %v1048_v2 = vsel %vm948_vm6, %v1770_v62, 0.0 }
 0x33b   : > { %1478 = vpow2.f32 %v1023_v63  ;;  %v1004_v3 = vsub.f32 %v1723_v15, %v972_v1  ;;  %1049 = vadd.xlane.f32.xlu1 %v1048_v2  ;;  %v975_v4 = vpop.xlane.xlu0 %974 }
 0x33c   : > { %v1005_v5 = vsub.f32 %v1729_v20, %v975_v4  ;;  %1480 = vpow2.f32 %v1025_v0 }
 0x33d   : > { %v1776_v6 = vpop.eup %1470  ;;  %v1027_v7 = vmul.f32 1.442695, %v1004_v3 }
 0x33e   : > { %v1778_v8 = vpop.eup %1472  ;;  %v1029_v9 = vmul.f32 1.442695, %v1005_v5  ;;  %v978_v10 = vpop.xlane.xlu1 %977  ;;  %v1054_v11 = vsel %vm948_vm6, %v1776_v6, 0.0 }
 0x33f   : > { %1482 = vpow2.f32 %v1027_v7  ;;  %v1006_v12 = vsub.f32 %v1731_v21, %v978_v10  ;;  %1055 = vadd.xlane.f32.xlu1 %v1054_v11  ;;  %v1045_v13 = vsel %vm948_vm6, %v1778_v8, 0.0  ;;  %v981_v14 = vpop.xlane.xlu0 %980 }
 0x340   : > { %1046 = vadd.xlane.f32.xlu0 %v1045_v13  ;;  %v1007_v15 = vsub.f32 %v1737_v26, %v981_v14  ;;  %1484 = vpow2.f32 %v1029_v9 }
 0x341   : > { %v1786_v16 = vpop.eup %1474  ;;  %v1031_v17 = vmul.f32 1.442695, %v1006_v12 }
 0x342   : > { %v1033_v18 = vmul.f32 1.442695, %v1007_v15  ;;  %v984_v19 = vpop.xlane.xlu1 %983  ;;  %v1051_v20 = vsel %vm948_vm6, %v1786_v16, 0.0  ;;  %v1791_v23 = vpop.eup %1476 }
 0x343   : > { %1486 = vpow2.f32 %v1031_v17  ;;  %v1008_v21 = vsub.f32 %v1739_v27, %v984_v19  ;;  %v987_v22 = vpop.xlane.xlu0 %986  ;;  %v1057_v27 = vsel %vm948_vm6, %v1791_v23, 0.0 }
 0x344   : > { %1052 = vadd.xlane.f32.xlu0 %v1051_v20  ;;  %v1009_v24 = vsub.f32 %v1745_v32, %v987_v22  ;;  %1488 = vpow2.f32 %v1033_v18 }
 0x345   : > { %v1794_v25 = vpop.eup %1478  ;;  %v1035_v26 = vmul.f32 1.442695, %v1008_v21 }
 0x346   : > { %v1037_v28 = vmul.f32 1.442695, %v1009_v24  ;;  %v990_v29 = vpop.xlane.xlu1 %989  ;;  %v1060_v30 = vsel %vm948_vm6, %v1794_v25, 0.0  ;;  %v1801_v35 = vpop.eup %1480 }
 0x347   : > { %1490 = vpow2.f32 %v1035_v26  ;;  %v1010_v31 = vsub.f32 %v1747_v33, %v990_v29  ;;  %1061 = vadd.xlane.f32.xlu1 %v1060_v30  ;;  %v993_v34 = vpop.xlane.xlu0 %992  ;;  %v1063_v43 = vsel %vm948_vm6, %v1801_v35, 0.0 }
 0x348   : > { %1058 = vadd.xlane.f32.xlu0 %v1057_v27  ;;  %v1011_v32 = vsub.f32 %v1753_v38, %v993_v34  ;;  %1492 = vpow2.f32 %v1037_v28 }
 0x349   : > { %v1804_v36 = vpop.eup %1482  ;;  %v1039_v37 = vmul.f32 1.442695, %v1010_v31 }
 0x34a   : > { %v1041_v40 = vmul.f32 1.442695, %v1011_v32  ;;  %v996_v41 = vpop.xlane.xlu1 %995  ;;  %v1066_v42 = vsel %vm948_vm6, %v1804_v36, 0.0  ;;  %v1811_v44 = vpop.eup %1484 }
 0x34b   : > { %1494 = vpow2.f32 %v1039_v37  ;;  %v1012_v33 = vsub.f32 %v1755_v39, %v996_v41  ;;  %1067 = vadd.xlane.f32.xlu1 %v1066_v42  ;;  %v1069_v47 = vsel %vm948_vm6, %v1811_v44, 0.0 }
 0x34c   : > { %1064 = vadd.xlane.f32.xlu0 %v1063_v43  ;;  %1496 = vpow2.f32 %v1041_v40 }
 0x34d   : > { %v1813_v38 = vpop.eup %1486  ;;  %v1043_v45 = vmul.f32 1.442695, %v1012_v33 }
 0x34e   : > { %v1072_v46 = vsel %vm948_vm6, %v1813_v38, 0.0  ;;  %v1819_v39 = vpop.eup %1488 }
 0x34f   : > { %1498 = vpow2.f32 %v1043_v45  ;;  %1073 = vadd.xlane.f32.xlu1 %v1072_v46  ;;  %v1075_v50 = vsel %vm948_vm6, %v1819_v39, 0.0 }
 0x350   : > { %1070 = vadd.xlane.f32.xlu0 %v1069_v47 }
 0x351   : > { %v1821_v48 = vpop.eup %1490 }
 0x352   : > { %v1078_v49 = vsel %vm948_vm6, %v1821_v48, 0.0  ;;  %v1827_v51 = vpop.eup %1492 }
 0x353   : > { %1079 = vadd.xlane.f32.xlu1 %v1078_v49  ;;  %v1081_v54 = vsel %vm948_vm6, %v1827_v51, 0.0 }
 0x354   : > { %1076 = vadd.xlane.f32.xlu0 %v1075_v50 }
 0x355   : > { %v1829_v52 = vpop.eup %1494 }
 0x356   : > { %v1084_v53 = vsel %vm948_vm6, %v1829_v52, 0.0  ;;  %v1835_v55 = vpop.eup %1496 }
 0x357   : > { %1085 = vadd.xlane.f32.xlu1 %v1084_v53  ;;  %v1087_v58 = vsel %vm948_vm6, %v1835_v55, 0.0 }
 0x358   : > { %1082 = vadd.xlane.f32.xlu0 %v1081_v54 }
 0x359   : > { %v1837_v56 = vpop.eup %1498 }
 0x35a   : > { %v1090_v57 = vsel %vm948_vm6, %v1837_v56, 0.0 }
 0x35b   : > { %1091 = vadd.xlane.f32.xlu1 %v1090_v57 }
 0x35c   : > { %1088 = vadd.xlane.f32.xlu0 %v1087_v58 }
 0x3c8   : > { %v1050_v59 = vpop.xlane.xlu1 %1049 }
 0x3c9   : > { %1500 = vrcp.f32 %v1050_v59 }
 0x3cc   : > { %v1056_v60 = vpop.xlane.xlu1 %1055 }
 0x3cd   : > { %1502 = vrcp.f32 %v1056_v60  ;;  %v1047_v61 = vpop.xlane.xlu0 %1046 }
 0x3ce   : > { %1504 = vrcp.f32 %v1047_v61 }
 0x3d1   : > { %v1053_v63 = vpop.xlane.xlu0 %1052 }
 0x3d2   : > { %1506 = vrcp.f32 %v1053_v63 }
 0x3d3   : > { %v1501_v0 = vpop.eup %1500 }
 0x3d4   : > { %v1110_v1 = vmul.f32 %v1501_v0, %v1050_v59  ;;  %v1062_v2 = vpop.xlane.xlu1 %1061 }
 0x3d5   : > { %1508 = vrcp.f32 %v1062_v2  ;;  %v1059_v3 = vpop.xlane.xlu0 %1058 }
 0x3d6   : > { %v1126_v4 = vsub.f32 2.0, %v1110_v1  ;;  %1510 = vrcp.f32 %v1059_v3 }
 0x3d7   : > { %v1503_v5 = vpop.eup %1502 }
 0x3d8   : > { %v1505_v7 = vpop.eup %1504  ;;  %v1142_v9 = vmul.f32 %v1501_v0, %v1126_v4  ;;  %v1112_v10 = vmul.f32 %v1503_v5, %v1056_v60  ;;  %v1068_v11 = vpop.xlane.xlu1 %1067 }
 0x3d9   : > { %v1109_v12 = vmul.f32 %v1505_v7, %v1047_v61  ;;  %1512 = vrcp.f32 %v1068_v11  ;;  %v1065_v13 = vpop.xlane.xlu0 %1064 }
 0x3da   : > { %v1158_v14 = vmul.f32 %v1770_v62, %v1142_v9  ;;  %v1128_v15 = vsub.f32 2.0, %v1112_v10  ;;  %1514 = vrcp.f32 %v1065_v13 }
 0x3db   : > { %v1125_v17 = vsub.f32 2.0, %v1109_v12 }
 0x3dc   : > { %v1507_v18 = vpop.eup %1506  ;;  %1174 = vst.msk [vmem:[%s1848_s27 + $0x8] sm:$0xff] %vm948_vm6, %v1158_v14  ;;  %v1144_v19 = vmul.f32 %v1503_v5, %v1128_v15  ;;  %v1074_v20 = vpop.xlane.xlu1 %1073 }
 0x3dd   : > { %v1141_v21 = vmul.f32 %v1505_v7, %v1125_v17  ;;  %v1111_v22 = vmul.f32 %v1507_v18, %v1053_v63  ;;  %1516 = vrcp.f32 %v1074_v20  ;;  %v1071_v24 = vpop.xlane.xlu0 %1070 }
 0x3de   : > { %v1160_v26 = vmul.f32 %v1776_v6, %v1144_v19  ;;  %1518 = vrcp.f32 %v1071_v24 }
 0x3df   : > { %v1509_v28 = vpop.eup %1508  ;;  %v1157_v62 = vmul.f32 %v1778_v8, %v1141_v21  ;;  %v1127_v29 = vsub.f32 2.0, %v1111_v22 }
 0x3e0   : > { %v1511_v30 = vpop.eup %1510  ;;  %1176 = vst.msk [vmem:[%s1848_s27 + $0x18] sm:$0xff] %vm948_vm6, %v1160_v26  ;;  %v1114_v31 = vmul.f32 %v1509_v28, %v1062_v2  ;;  %v1080_v27 = vpop.xlane.xlu1 %1079 }
 0x3e1   : > { %1173 = vst.msk [vmem:[%s1848_s27] sm:$0xff] %vm948_vm6, %v1157_v62  ;;  %v1143_v34 = vmul.f32 %v1507_v18, %v1127_v29  ;;  %v1113_v32 = vmul.f32 %v1511_v30, %v1059_v3  ;;  %1520 = vrcp.f32 %v1080_v27  ;;  %v1077_v37 = vpop.xlane.xlu0 %1076 }
 0x3e2   : > { %v1130_v40 = vsub.f32 2.0, %v1114_v31  ;;  %1522 = vrcp.f32 %v1077_v37 }
 0x3e3   : > { %v1513_v6 = vpop.eup %1512  ;;  %v1159_v41 = vmul.f32 %v1786_v16, %v1143_v34  ;;  %v1129_v42 = vsub.f32 2.0, %v1113_v32 }
 0x3e4   : > { %v1515_v8 = vpop.eup %1514  ;;  %v1146_v33 = vmul.f32 %v1509_v28, %v1130_v40  ;;  %v1116_v43 = vmul.f32 %v1513_v6, %v1068_v11  ;;  %v1086_v45 = vpop.xlane.xlu1 %1085 }
 0x3e5   : > { %1175 = vst.msk [vmem:[%s1848_s27 + $0x10] sm:$0xff] %vm948_vm6, %v1159_v41  ;;  %v1145_v46 = vmul.f32 %v1511_v30, %v1129_v42  ;;  %v1115_v47 = vmul.f32 %v1515_v8, %v1065_v13  ;;  %1524 = vrcp.f32 %v1086_v45  ;;  %v1083_v49 = vpop.xlane.xlu0 %1082 }
 0x3e6   : > { %v1162_v50 = vmul.f32 %v1794_v25, %v1146_v33  ;;  %v1132_v53 = vsub.f32 2.0, %v1116_v43  ;;  %1526 = vrcp.f32 %v1083_v49 }
 0x3e7   : > { %v1517_v54 = vpop.eup %1516  ;;  %v1161_v16 = vmul.f32 %v1791_v23, %v1145_v46  ;;  %v1131_v57 = vsub.f32 2.0, %v1115_v47 }
 0x3e8   : > { %v1519_v58 = vpop.eup %1518  ;;  %1178 = vst.msk [vmem:[%s1848_s27 + $0x28] sm:$0xff] %vm948_vm6, %v1162_v50  ;;  %v1148_v59 = vmul.f32 %v1513_v6, %v1132_v53  ;;  %v1118_v60 = vmul.f32 %v1517_v54, %v1074_v20  ;;  %v1092_v61 = vpop.xlane.xlu1 %1091 }
 0x3e9   : > { %1177 = vst.msk [vmem:[%s1848_s27 + $0x20] sm:$0xff] %vm948_vm6, %v1161_v16  ;;  %v1147_v63 = vmul.f32 %v1515_v8, %v1131_v57  ;;  %v1117_v0 = vmul.f32 %v1519_v58, %v1071_v24  ;;  %1528 = vrcp.f32 %v1092_v61  ;;  %v1089_v25 = vpop.xlane.xlu0 %1088 }
 0x3ea   : > { %v1164_v1 = vmul.f32 %v1804_v36, %v1148_v59  ;;  %v1134_v2 = vsub.f32 2.0, %v1118_v60  ;;  %1530 = vrcp.f32 %v1089_v25 }
 0x3eb   : > { %v1521_v23 = vpop.eup %1520  ;;  %v1163_v3 = vmul.f32 %v1801_v35, %v1147_v63  ;;  %v1133_v4 = vsub.f32 2.0, %v1117_v0 }
 0x3ec   : > { %v1523_v5 = vpop.eup %1522  ;;  %1180 = vst.msk [vmem:[%s1848_s27 + $0x38] sm:$0xff] %vm948_vm6, %v1164_v1  ;;  %v1150_v7 = vmul.f32 %v1517_v54, %v1134_v2  ;;  %v1120_v9 = vmul.f32 %v1521_v23, %v1080_v27 }
 0x3ed   : > { %1179 = vst.msk [vmem:[%s1848_s27 + $0x30] sm:$0xff] %vm948_vm6, %v1163_v3  ;;  %v1149_v10 = vmul.f32 %v1519_v58, %v1133_v4  ;;  %v1119_v11 = vmul.f32 %v1523_v5, %v1077_v37 }
 0x3ee   : > { %v1166_v12 = vmul.f32 %v1813_v38, %v1150_v7  ;;  %v1136_v36 = vsub.f32 2.0, %v1120_v9 }
 0x3ef   : > { %v1525_v13 = vpop.eup %1524  ;;  %v1165_v14 = vmul.f32 %v1811_v44, %v1149_v10  ;;  %v1135_v15 = vsub.f32 2.0, %v1119_v11 }
 0x3f0   : > { %v1527_v35 = vpop.eup %1526  ;;  %1182 = vst.msk [vmem:[%s1848_s27 + $0x48] sm:$0xff] %vm948_vm6, %v1166_v12  ;;  %v1152_v17 = vmul.f32 %v1521_v23, %v1136_v36  ;;  %v1122_v18 = vmul.f32 %v1525_v13, %v1086_v45 }
 0x3f1   : > { %1181 = vst.msk [vmem:[%s1848_s27 + $0x40] sm:$0xff] %vm948_vm6, %v1165_v14  ;;  %v1151_v19 = vmul.f32 %v1523_v5, %v1135_v15  ;;  %v1121_v20 = vmul.f32 %v1527_v35, %v1083_v49 }
 0x3f2   : > { %v1168_v21 = vmul.f32 %v1821_v48, %v1152_v17  ;;  %v1138_v38 = vsub.f32 2.0, %v1122_v18 }
 0x3f3   : > { %v1529_v22 = vpop.eup %1528  ;;  %v1167_v24 = vmul.f32 %v1819_v39, %v1151_v19  ;;  %v1137_v44 = vsub.f32 2.0, %v1121_v20 }
 0x3f4   : > { %v1531_v26 = vpop.eup %1530  ;;  %1184 = vst.msk [vmem:[%s1848_s27 + $0x58] sm:$0xff] %vm948_vm6, %v1168_v21  ;;  %v1154_v28 = vmul.f32 %v1525_v13, %v1138_v38  ;;  %v1124_v62 = vmul.f32 %v1529_v22, %v1092_v61 }
 0x3f5   : > { %1183 = vst.msk [vmem:[%s1848_s27 + $0x50] sm:$0xff] %vm948_vm6, %v1167_v24  ;;  %v1153_v29 = vmul.f32 %v1527_v35, %v1137_v44  ;;  %v1123_v30 = vmul.f32 %v1531_v26, %v1089_v25 }
 0x3f6   : > { %v1170_v48 = vmul.f32 %v1829_v52, %v1154_v28  ;;  %v1140_v31 = vsub.f32 2.0, %v1124_v62 }
 0x3f7   : > { %v1169_v27 = vmul.f32 %v1827_v51, %v1153_v29  ;;  %v1139_v34 = vsub.f32 2.0, %v1123_v30 }
 0x3f8   : > { %1186 = vst.msk [vmem:[%s1848_s27 + $0x68] sm:$0xff] %vm948_vm6, %v1170_v48  ;;  %v1156_v39 = vmul.f32 %v1529_v22, %v1140_v31 }
 0x3f9   : > { %1185 = vst.msk [vmem:[%s1848_s27 + $0x60] sm:$0xff] %vm948_vm6, %v1169_v27  ;;  %v1155_v32 = vmul.f32 %v1531_v26, %v1139_v34 }
 0x3fa   : > { %v1172_v37 = vmul.f32 %v1837_v56, %v1156_v39 }
 0x3fb   : > { %v1171_v40 = vmul.f32 %v1835_v55, %v1155_v32 }
 0x3fc   : > { %1188 = vst.msk [vmem:[%s1848_s27 + $0x78] sm:$0xff] %vm948_vm6, %v1172_v37 }
 0x3fd   : > { %1187 = vst.msk [vmem:[%s1848_s27 + $0x70] sm:$0xff] %vm948_vm6, %v1171_v40 }
 0x3fe PF: > { %s17_s24 = sadd.s32 1, %s1538_s24  }
 0x3ff   : > { %p14_p4 = scmp.ge.s32.totalorder %s17_s24, 4  }
 0x401   :  { %16 = sbr.rel (!%p14_p4) target bundleno = 1 (0x1), region = 78 }

</bundles_post_ra>
